<compile_context>
chip_gen: v5e
topology: v5e:2x2
jax: 0.10.0
libtpu: 0.0.40
codegen_flags: <defaults>
</compile_context>

<pallas_src>
import jax
import jax.numpy as jnp
from jax.experimental import pallas as pl
from jax.experimental.pallas import tpu as pltpu


def _round_up(x, m):
    return ((x + m - 1) // m) * m


def dqn_kernel(x_ref, w0_ref, b0_ref, w1_ref, b1_ref, w2_ref, b2_ref, out_ref):
    # body: Linear(D, 128) + ReLU. x is f32 in HBM; cast to bf16 in-kernel so
    # the MXU runs bf16 with f32 accumulation (layer 0 is ~1.5% of FLOPs).
    x = x_ref[...].astype(w0_ref.dtype)
    h = jnp.dot(x, w0_ref[...], preferred_element_type=jnp.float32)
    h = jnp.maximum(h + b0_ref[...], 0.0)
    # fc1: Linear(128, 512) + ReLU
    h = jnp.dot(h.astype(w1_ref.dtype), w1_ref[...],
                preferred_element_type=jnp.float32)
    h = jnp.maximum(h + b1_ref[...], 0.0)
    # fc2: Linear(512, num_actions) -- narrow output stored directly (tb, A)
    o = jnp.dot(h.astype(w2_ref.dtype), w2_ref[...],
                preferred_element_type=jnp.float32)
    out_ref[...] = (o + b2_ref[...]).astype(out_ref.dtype)


def prepare_dqn_params(params, compute_dtype=jnp.bfloat16):
    """One-time prep: bf16 weights for the MXU, f32 biases for the epilogue.

    Hoisted out of the per-call path so each forward does no weight casting,
    padding, or scattering.
    """
    w0, b0, w1, b1, w2, b2 = params
    return (
        w0.astype(compute_dtype), b0.astype(jnp.float32),
        w1.astype(compute_dtype), b1.astype(jnp.float32),
        w2.astype(compute_dtype), b2.astype(jnp.float32),
    )


def _pick_batch_tile(B, block_b):
    """>=256 rows when possible (MXU fill, step-overhead amortization), but
    always >=2 grid steps for B > 256 so both v7x TensorCores get work."""
    if B <= 256:
        return max(8, _round_up(B, 8))
    tb = min(block_b, max(256, _round_up(pl.cdiv(B, 4), 8)))
    return tb


def dqn_forward(x, prepared_params, *, block_b=512):
    """Fused 3-layer MLP forward.

    x: [B, D] float32.  prepared_params: output of prepare_dqn_params().
    Returns [B, num_actions] float32 Q-values.
    """
    w0, b0, w1, b1, w2, b2 = prepared_params
    B, D = x.shape
    H0 = w0.shape[1]          # 128
    H1 = w1.shape[1]          # 512
    A = w2.shape[1]           # num_actions

    tb = _pick_batch_tile(B, block_b)
    grid = (pl.cdiv(B, tb),)  # ragged last tile handled by Pallas masking

    in_specs = [
        pl.BlockSpec((tb, D), lambda i: (i, 0)),    # x tile (batch-pipelined)
        pl.BlockSpec((D, H0), lambda i: (0, 0)),    # w0 (resident)
        pl.BlockSpec((1, H0), lambda i: (0, 0)),    # b0
        pl.BlockSpec((H0, H1), lambda i: (0, 0)),   # w1
        pl.BlockSpec((1, H1), lambda i: (0, 0)),    # b1
        pl.BlockSpec((H1, A), lambda i: (0, 0)),    # w2
        pl.BlockSpec((1, A), lambda i: (0, 0)),     # b2
    ]
    out_specs = pl.BlockSpec((tb, A), lambda i: (i, 0))

    w_itemsize = jnp.dtype(w0.dtype).itemsize
    flops = 2 * B * (D * H0 + H0 * H1 + H1 * A)
    bytes_accessed = (
        B * D * 4                                   # x (f32)
        + (D * H0 + H0 * H1 + H1 * A) * w_itemsize  # weights (bf16)
        + (H0 + H1 + A) * 4                         # biases (f32)
        + B * A * 4                                 # output (f32, narrow)
    )
    cost = pl.CostEstimate(flops=flops, transcendentals=0,
                           bytes_accessed=bytes_accessed)

    out = pl.pallas_call(
        dqn_kernel,
        out_shape=jax.ShapeDtypeStruct((B, A), jnp.float32),
        grid_spec=pltpu.PrefetchScalarGridSpec(
            num_scalar_prefetch=0,
            grid=grid,
            in_specs=in_specs,
            out_specs=out_specs,
        ),
        compiler_params=pltpu.CompilerParams(
            dimension_semantics=("parallel",),
            vmem_limit_bytes=32 * 1024 * 1024,
        ),
        cost_estimate=cost,
    )(x, w0, b0, w1, b1, w2, b2)

    return out


def init_dqn_params(key, input_dim, num_actions):
    """Deterministic init mimicking torch.nn.Linear default:
    U(-1/sqrt(fan_in), 1/sqrt(fan_in)) for both weight and bias."""
    dims = [(input_dim, 128), (128, 512), (512, num_actions)]
    params = []
    for (fan_in, fan_out) in dims:
        key, kw, kb = jax.random.split(key, 3)
        bound = 1.0 / jnp.sqrt(jnp.float32(fan_in))
        w = jax.random.uniform(kw, (fan_in, fan_out), jnp.float32, -bound, bound)
        b = jax.random.uniform(kb, (1, fan_out), jnp.float32, -bound, bound)
        params += [w, b]
    return tuple(params)


def dqn_reference(x, params):
    w0, b0, w1, b1, w2, b2 = params
    h = jnp.maximum(x @ w0 + b0, 0.0)
    h = jnp.maximum(h @ w1 + b1, 0.0)
    return h @ w2 + b2


if __name__ == "__main__":
    key = jax.random.PRNGKey(0)
    B, D, A = 8, 16, 6          # batch=8, input_shape=(16,), num_actions=6
    kx, kp, kx2 = jax.random.split(key, 3)
    x = jax.random.normal(kx, (B, D), jnp.float32)
    params = init_dqn_params(kp, D, A)
    prepared = prepare_dqn_params(params)   # one-time weight prep (hoisted)

    out = jax.block_until_ready(dqn_forward(x, prepared))
    ref = dqn_reference(x, params)
    assert out.shape == (B, A)
    # bf16 MXU operands (f32 accumulate) -> loosened tolerance vs f32 reference.
    assert jnp.allclose(out, ref, atol=5e-2, rtol=5e-2), "mismatch (small batch)"

    # Second check: ragged batch + multi-step grid exercises the pipelined path
    # (B=300 -> tb=256, grid=(2,), masked partial last tile).
    B2 = 300
    x2 = jax.random.normal(kx2, (B2, D), jnp.float32)
    out2 = jax.block_until_ready(dqn_forward(x2, prepared))
    ref2 = dqn_reference(x2, params)
    assert out2.shape == (B2, A)
    assert jnp.allclose(out2, ref2, atol=5e-2, rtol=5e-2), "mismatch (tiled batch)"

    print("KERNEL_OK")
</pallas_src>

<mosaic_0001>
module attributes {stable_mosaic.version = 11 : i64} {
  func.func @dqn_kernel(%arg0: i32, %arg1: memref<8x16xf32, #tpu.memory_space<vmem>>, %arg2: memref<16x128xbf16, #tpu.memory_space<vmem>>, %arg3: memref<1x128xf32, #tpu.memory_space<vmem>>, %arg4: memref<128x512xbf16, #tpu.memory_space<vmem>>, %arg5: memref<1x512xf32, #tpu.memory_space<vmem>>, %arg6: memref<512x6xbf16, #tpu.memory_space<vmem>>, %arg7: memref<1x6xf32, #tpu.memory_space<vmem>>, %arg8: memref<8x6xf32, #tpu.memory_space<vmem>>) attributes {dimension_semantics = [#tpu.dimension_semantics<parallel>], iteration_bounds = array<i64: 1>, scalar_prefetch = 0 : i64, scratch_operands = 0 : i64, tpu.core_type = #tpu.core_type<tc>, window_params = [{transform_indices = @transform_0, window_bounds = array<i64: 8, 16>}, {pipeline_mode = #tpu.pipeline_mode<synchronous>, transform_indices = @transform_1, window_bounds = array<i64: 16, 128>}, {pipeline_mode = #tpu.pipeline_mode<synchronous>, transform_indices = @transform_2, window_bounds = array<i64: 1, 128>}, {pipeline_mode = #tpu.pipeline_mode<synchronous>, transform_indices = @transform_3, window_bounds = array<i64: 128, 512>}, {pipeline_mode = #tpu.pipeline_mode<synchronous>, transform_indices = @transform_4, window_bounds = array<i64: 1, 512>}, {pipeline_mode = #tpu.pipeline_mode<synchronous>, transform_indices = @transform_5, window_bounds = array<i64: 512, 6>}, {pipeline_mode = #tpu.pipeline_mode<synchronous>, transform_indices = @transform_6, window_bounds = array<i64: 1, 6>}, {transform_indices = @transform_7, window_bounds = array<i64: 8, 6>}]} {
    %c0 = arith.constant 0 : index
    %c0_0 = arith.constant 0 : index
    %0 = vector.load %arg1[%c0, %c0_0] : memref<8x16xf32, #tpu.memory_space<vmem>>, vector<8x16xf32>
    %1 = arith.truncf %0 : vector<8x16xf32> to vector<8x16xbf16>
    %c0_1 = arith.constant 0 : index
    %c0_2 = arith.constant 0 : index
    %2 = vector.load %arg2[%c0_1, %c0_2] : memref<16x128xbf16, #tpu.memory_space<vmem>>, vector<16x128xbf16>
    %cst = arith.constant dense<0.000000e+00> : vector<8x128xf32>
    %3 = tpu.matmul %1, %2, %cst {dimension_numbers = #tpu.dot_dimension_numbers<[1], [0], [0], [1], [0, 0, 1, 1], [], []>} : vector<8x16xbf16>, vector<16x128xbf16>, vector<8x128xf32> -> vector<8x128xf32>
    %c0_3 = arith.constant 0 : index
    %c0_4 = arith.constant 0 : index
    %4 = vector.load %arg3[%c0_3, %c0_4] : memref<1x128xf32, #tpu.memory_space<vmem>>, vector<1x128xf32>
    %5 = vector.broadcast %4 : vector<1x128xf32> to vector<8x128xf32>
    %6 = arith.addf %3, %5 : vector<8x128xf32>
    %cst_5 = arith.constant 0.000000e+00 : f32
    %7 = vector.broadcast %cst_5 : f32 to vector<8x128xf32>
    %8 = arith.maximumf %6, %7 : vector<8x128xf32>
    %9 = arith.truncf %8 : vector<8x128xf32> to vector<8x128xbf16>
    %c0_6 = arith.constant 0 : index
    %c0_7 = arith.constant 0 : index
    %10 = vector.load %arg4[%c0_6, %c0_7] : memref<128x512xbf16, #tpu.memory_space<vmem>>, vector<128x512xbf16>
    %cst_8 = arith.constant dense<0.000000e+00> : vector<8x512xf32>
    %11 = tpu.matmul %9, %10, %cst_8 {dimension_numbers = #tpu.dot_dimension_numbers<[1], [0], [0], [1], [0, 0, 1, 1], [], []>} : vector<8x128xbf16>, vector<128x512xbf16>, vector<8x512xf32> -> vector<8x512xf32>
    %c0_9 = arith.constant 0 : index
    %c0_10 = arith.constant 0 : index
    %12 = vector.load %arg5[%c0_9, %c0_10] : memref<1x512xf32, #tpu.memory_space<vmem>>, vector<1x512xf32>
    %13 = vector.broadcast %12 : vector<1x512xf32> to vector<8x512xf32>
    %14 = arith.addf %11, %13 : vector<8x512xf32>
    %cst_11 = arith.constant 0.000000e+00 : f32
    %15 = vector.broadcast %cst_11 : f32 to vector<8x512xf32>
    %16 = arith.maximumf %14, %15 : vector<8x512xf32>
    %17 = arith.truncf %16 : vector<8x512xf32> to vector<8x512xbf16>
    %c0_12 = arith.constant 0 : index
    %c0_13 = arith.constant 0 : index
    %18 = vector.load %arg6[%c0_12, %c0_13] : memref<512x6xbf16, #tpu.memory_space<vmem>>, vector<512x6xbf16>
    %cst_14 = arith.constant dense<0.000000e+00> : vector<8x6xf32>
    %19 = tpu.matmul %17, %18, %cst_14 {dimension_numbers = #tpu.dot_dimension_numbers<[1], [0], [0], [1], [0, 0, 1, 1], [], []>} : vector<8x512xbf16>, vector<512x6xbf16>, vector<8x6xf32> -> vector<8x6xf32>
    %c0_15 = arith.constant 0 : index
    %c0_16 = arith.constant 0 : index
    %20 = vector.load %arg7[%c0_15, %c0_16] : memref<1x6xf32, #tpu.memory_space<vmem>>, vector<1x6xf32>
    %21 = vector.broadcast %20 : vector<1x6xf32> to vector<8x6xf32>
    %22 = arith.addf %19, %21 : vector<8x6xf32>
    %c0_17 = arith.constant 0 : index
    %c0_18 = arith.constant 0 : index
    %23 = vector.load %arg8[%c0_17, %c0_18] : memref<8x6xf32, #tpu.memory_space<vmem>>, vector<8x6xf32>
    tpu.vector_store %arg8[%c0_17, %c0_18], %22 {strides = array<i32>} : memref<8x6xf32, #tpu.memory_space<vmem>>, vector<8x6xf32>,
    return
  }
  func.func @transform_0(%arg0: i32) -> (i32, i32) {
    %c0_i32 = arith.constant 0 : i32
    %c0_i32_0 = arith.constant 0 : i32
    return %arg0, %c0_i32 : i32, i32
  }
  func.func @transform_1(%arg0: i32) -> (i32, i32) {
    %c0_i32 = arith.constant 0 : i32
    %c0_i32_0 = arith.constant 0 : i32
    %c0_i32_1 = arith.constant 0 : i32
    return %c0_i32, %c0_i32_0 : i32, i32
  }
  func.func @transform_2(%arg0: i32) -> (i32, i32) {
    %c0_i32 = arith.constant 0 : i32
    %c0_i32_0 = arith.constant 0 : i32
    %c0_i32_1 = arith.constant 0 : i32
    return %c0_i32, %c0_i32_0 : i32, i32
  }
  func.func @transform_3(%arg0: i32) -> (i32, i32) {
    %c0_i32 = arith.constant 0 : i32
    %c0_i32_0 = arith.constant 0 : i32
    %c0_i32_1 = arith.constant 0 : i32
    return %c0_i32, %c0_i32_0 : i32, i32
  }
  func.func @transform_4(%arg0: i32) -> (i32, i32) {
    %c0_i32 = arith.constant 0 : i32
    %c0_i32_0 = arith.constant 0 : i32
    %c0_i32_1 = arith.constant 0 : i32
    return %c0_i32, %c0_i32_0 : i32, i32
  }
  func.func @transform_5(%arg0: i32) -> (i32, i32) {
    %c0_i32 = arith.constant 0 : i32
    %c0_i32_0 = arith.constant 0 : i32
    %c0_i32_1 = arith.constant 0 : i32
    return %c0_i32, %c0_i32_0 : i32, i32
  }
  func.func @transform_6(%arg0: i32) -> (i32, i32) {
    %c0_i32 = arith.constant 0 : i32
    %c0_i32_0 = arith.constant 0 : i32
    %c0_i32_1 = arith.constant 0 : i32
    return %c0_i32, %c0_i32_0 : i32, i32
  }
  func.func @transform_7(%arg0: i32) -> (i32, i32) {
    %c0_i32 = arith.constant 0 : i32
    %c0_i32_0 = arith.constant 0 : i32
    return %arg0, %c0_i32 : i32, i32
  }
}

</mosaic_0001>

<bundles_post_ra>
// kernel: tpu_custom_call.1
= control target key start
LH: loop header
LB: loop body
LE: loop exit
PB: predicated region body
PF: predicated region fallthrough
CT: control target
= control target key end

     0   :  { %12 = vsyncpa [#allocation3], 0  ;;  %s1399_s0 = inlined_call_operand.vmem [shape: f32[8,16], index: 0, kind: input, shape index: {}]   ;;  %s1400_s1 = inlined_call_operand.vmem [shape: bf16[16,128], index: 1, kind: input, shape index: {}]   ;;  %s1401_s2 = inlined_call_operand.vmem [shape: f32[1,128], index: 2, kind: input, shape index: {}]   ;;  %s1402_s3 = inlined_call_operand.vmem [shape: bf16[128,512], index: 3, kind: input, shape index: {}]   ;;  %s1403_s4 = inlined_call_operand.hbm [shape: f32[1,512], index: 4, kind: input, shape index: {}]   ;;  %s1404_s5 = inlined_call_operand.vmem [shape: bf16[512,6], index: 5, kind: input, shape index: {}]   ;;  %s1405_s6 = inlined_call_operand.vmem [shape: f32[1,6], index: 6, kind: input, shape index: {}]   ;;  %s1406_s7 = inlined_call_operand.hbm [shape: f32[8,6], index: 7, kind: output, shape index: {}]  }
   0x1   :  { %13 = vsyncpa [#allocation4], 0  ;;  %s27_s26 = sshll.u32 %s1403_s4, 4  ;;  %s1050_s27 = smov [#allocation2]   ;;  %s28_s26 = int_to_ptr.hbm [resolvable:$true] %s27_s26 }
   0x2   :  { %s29_s28 = sshll.u32 %s1050_s27, 4  ;;  %s30_s28 = int_to_ptr.vmem [resolvable:$true] %s29_s28 }
   0x3   :  { %32 = dma.hbm_to_vmem [thread:$0]  %s28_s26, 64, %s30_s28, [#allocation3]  }
   0x4   :  { %1046 = dma.done.wait [#allocation3], 64  }
   0x5   :  { %1047 = vsyncadd [#allocation3], 4294967232  ;;  %v929_v0 = vld [vmem:[%s1400_s1] sm:$0xff]  ;;  %vm56_vm0 = vcmask 130048   ;;  %v960_v4 = vld [vmem:[%s1402_s3 + $0xec] sm:$0xf0] }
   0x6   :  { %v42_v1 = vld [vmem:[%s1399_s0] sm:$0xff]  ;;  %v789_v6 = vld [vmem:[%s1402_s3 + $0xf0] sm:$0xf0]  ;;  %67 = vmatpush.bf16.msra.mxu0 %v929_v0  ;;  %v795_v9 = vld [vmem:[%s1402_s3 + $0xe8] sm:$0xf]  ;;  %s1051_s16 = smov [#allocation5]  }
   0x7   :  { %v787_v2 = vld [vmem:[%s1402_s3 + $0xe0] sm:$0xf]  ;;  %v43_v3 = vpack.c.bf16 %v42_v1, %v42_v1  ;;  %v958_v5 = vld [vmem:[%s1402_s3 + $0xe4] sm:$0xf]  ;;  %v961_v10 = vld [vmem:[%s1402_s3 + $0xf4] sm:$0xf0] }
   0x8   :  { %v788_v7 = vor.u32 %v960_v4, %v787_v2  ;;  %v792_v8 = vor.u32 %v958_v5, %v789_v6  ;;  %v959_v11 = vld [vmem:[%s1402_s3 + $0xec] sm:$0xf]  ;;  %v796_v12 = vor.u32 %v961_v10, %v795_v9  ;;  %v797_v13 = vld [vmem:[%s1402_s3 + $0xf8] sm:$0xf0]  ;;  %v771_v14 = vld [vmem:[%s1402_s3 + $0xc0] sm:$0xf] }
   0x9   :  { %v956_v15 = vld [vmem:[%s1402_s3 + $0xcc] sm:$0xf0]  ;;  %v800_v16 = vor.u32 %v959_v11, %v797_v13  ;;  %v954_v18 = vld [vmem:[%s1402_s3 + $0xc4] sm:$0xf]  ;;  %v773_v19 = vld [vmem:[%s1402_s3 + $0xd0] sm:$0xf0]  ;;  %672 = vmatmul.msk.bf16.vlgmr.msra.gmra.mxu0 %vm56_vm0, %v43_v3 }
   0xa   :  { %277 = vmatpush.bf16.msra.mxu1 %v788_v7  ;;  %290 = vmatpush.bf16.msra.mxu2 %v792_v8  ;;  %v772_v17 = vor.u32 %v956_v15, %v771_v14  ;;  %v779_v20 = vld [vmem:[%s1402_s3 + $0xc8] sm:$0xf]  ;;  %v776_v21 = vor.u32 %v954_v18, %v773_v19  ;;  %v957_v22 = vld [vmem:[%s1402_s3 + $0xd4] sm:$0xf0]  ;;  %v955_v23 = vld [vmem:[%s1402_s3 + $0xcc] sm:$0xf] }
   0xb   :  { %303 = vmatpush.bf16.msra.mxu3 %v796_v12  ;;  %v781_v24 = vld [vmem:[%s1402_s3 + $0xd8] sm:$0xf0]  ;;  %316 = vmatpush.bf16.msrb.mxu0 %v800_v16  ;;  %v780_v25 = vor.u32 %v957_v22, %v779_v20  ;;  %v755_v27 = vld [vmem:[%s1402_s3 + $0xa0] sm:$0xf]  ;;  %v952_v28 = vld [vmem:[%s1402_s3 + $0xac] sm:$0xf0] }
   0xc   :  { %v784_v26 = vor.u32 %v955_v23, %v781_v24  ;;  %v950_v29 = vld [vmem:[%s1402_s3 + $0xa4] sm:$0xf]  ;;  %v757_v30 = vld [vmem:[%s1402_s3 + $0xb0] sm:$0xf0]  ;;  %v763_v31 = vld [vmem:[%s1402_s3 + $0xa8] sm:$0xf]  ;;  %v756_v33 = vor.u32 %v952_v28, %v755_v27 }
   0xd   :  { %v953_v32 = vld [vmem:[%s1402_s3 + $0xb4] sm:$0xf0]  ;;  %v760_v34 = vor.u32 %v950_v29, %v757_v30  ;;  %v951_v35 = vld [vmem:[%s1402_s3 + $0xac] sm:$0xf]  ;;  %v765_v36 = vld [vmem:[%s1402_s3 + $0xb8] sm:$0xf0] }
   0xe   :  { %278 = vmatpush.bf16.msra.mxu1 %v772_v17  ;;  %291 = vmatpush.bf16.msra.mxu2 %v776_v21  ;;  %v739_v37 = vld [vmem:[%s1402_s3 + $0x80] sm:$0xf]  ;;  %v764_v38 = vor.u32 %v953_v32, %v763_v31  ;;  %v948_v39 = vld [vmem:[%s1402_s3 + $0x8c] sm:$0xf0]  ;;  %v946_v40 = vld [vmem:[%s1402_s3 + $0x84] sm:$0xf]  ;;  %v768_v42 = vor.u32 %v951_v35, %v765_v36 }
   0xf   :  { %304 = vmatpush.bf16.msra.mxu3 %v780_v25  ;;  %v741_v41 = vld [vmem:[%s1402_s3 + $0x90] sm:$0xf0]  ;;  %317 = vmatpush.bf16.msrb.mxu0 %v784_v26  ;;  %v747_v43 = vld [vmem:[%s1402_s3 + $0x88] sm:$0xf]  ;;  %v949_v44 = vld [vmem:[%s1402_s3 + $0x94] sm:$0xf0]  ;;  %v740_v47 = vor.u32 %v948_v39, %v739_v37 }
  0x10   :  { %v947_v45 = vld [vmem:[%s1402_s3 + $0x8c] sm:$0xf]  ;;  %v749_v46 = vld [vmem:[%s1402_s3 + $0x98] sm:$0xf0]  ;;  %v744_v48 = vor.u32 %v946_v40, %v741_v41  ;;  %v723_v49 = vld [vmem:[%s1402_s3 + $0x60] sm:$0xf]  ;;  %v748_v50 = vor.u32 %v949_v44, %v747_v43 }
  0x11   :  { %v944_v51 = vld [vmem:[%s1402_s3 + $0x6c] sm:$0xf0]  ;;  %v942_v52 = vld [vmem:[%s1402_s3 + $0x64] sm:$0xf]  ;;  %v725_v53 = vld [vmem:[%s1402_s3 + $0x70] sm:$0xf0]  ;;  %v752_v54 = vor.u32 %v947_v45, %v749_v46 }
  0x12   :  { %279 = vmatpush.bf16.msra.mxu1 %v756_v33  ;;  %292 = vmatpush.bf16.msra.mxu2 %v760_v34  ;;  %v731_v55 = vld [vmem:[%s1402_s3 + $0x68] sm:$0xf]  ;;  %v945_v56 = vld [vmem:[%s1402_s3 + $0x74] sm:$0xf0]  ;;  %v943_v57 = vld [vmem:[%s1402_s3 + $0x6c] sm:$0xf]  ;;  %v724_v59 = vor.u32 %v944_v51, %v723_v49  ;;  %v728_v60 = vor.u32 %v942_v52, %v725_v53 }
  0x13   :  { %305 = vmatpush.bf16.msra.mxu3 %v764_v38  ;;  %318 = vmatpush.bf16.msrb.mxu0 %v768_v42  ;;  %v733_v58 = vld [vmem:[%s1402_s3 + $0x78] sm:$0xf0]  ;;  %v707_v61 = vld [vmem:[%s1402_s3 + $0x40] sm:$0xf]  ;;  %v940_v62 = vld [vmem:[%s1402_s3 + $0x4c] sm:$0xf0]  ;;  %v732_v63 = vor.u32 %v945_v56, %v731_v55 }
  0x14   :  { %v938_v0 = vld [vmem:[%s1402_s3 + $0x44] sm:$0xf]  ;;  %v709_v1 = vld [vmem:[%s1402_s3 + $0x50] sm:$0xf0]  ;;  %v736_v2 = vor.u32 %v943_v57, %v733_v58  ;;  %v715_v3 = vld [vmem:[%s1402_s3 + $0x48] sm:$0xf]  ;;  %v708_v7 = vor.u32 %v940_v62, %v707_v61 }
  0x15   :  { %v941_v4 = vld [vmem:[%s1402_s3 + $0x54] sm:$0xf0]  ;;  %v939_v5 = vld [vmem:[%s1402_s3 + $0x4c] sm:$0xf]  ;;  %v717_v6 = vld [vmem:[%s1402_s3 + $0x58] sm:$0xf0]  ;;  %v712_v8 = vor.u32 %v938_v0, %v709_v1 }
  0x16   :  { %280 = vmatpush.bf16.msra.mxu1 %v740_v47  ;;  %293 = vmatpush.bf16.msra.mxu2 %v744_v48  ;;  %v716_v9 = vor.u32 %v941_v4, %v715_v3  ;;  %v720_v10 = vor.u32 %v939_v5, %v717_v6  ;;  %v691_v11 = vld [vmem:[%s1402_s3 + $0x20] sm:$0xf]  ;;  %v936_v12 = vld [vmem:[%s1402_s3 + $0x2c] sm:$0xf0]  ;;  %v934_v13 = vld [vmem:[%s1402_s3 + $0x24] sm:$0xf] }
  0x17   :  { %306 = vmatpush.bf16.msra.mxu3 %v748_v50  ;;  %319 = vmatpush.bf16.msrb.mxu0 %v752_v54  ;;  %v692_v14 = vor.u32 %v936_v12, %v691_v11  ;;  %v693_v15 = vld [vmem:[%s1402_s3 + $0x30] sm:$0xf0]  ;;  %v699_v16 = vld [vmem:[%s1402_s3 + $0x28] sm:$0xf]  ;;  %v937_v17 = vld [vmem:[%s1402_s3 + $0x34] sm:$0xf0] }
  0x18   :  { %v696_v18 = vor.u32 %v934_v13, %v693_v15  ;;  %v700_v19 = vor.u32 %v937_v17, %v699_v16  ;;  %v935_v20 = vld [vmem:[%s1402_s3 + $0x2c] sm:$0xf]  ;;  %v701_v21 = vld [vmem:[%s1402_s3 + $0x38] sm:$0xf0]  ;;  %v675_v23 = vld [vmem:[%s1402_s3] sm:$0xf] }
  0x19   :  { %v704_v22 = vor.u32 %v935_v20, %v701_v21  ;;  %v932_v24 = vld [vmem:[%s1402_s3 + $0xc] sm:$0xf0]  ;;  %v930_v25 = vld [vmem:[%s1402_s3 + $0x4] sm:$0xf]  ;;  %v677_v27 = vld [vmem:[%s1402_s3 + $0x10] sm:$0xf0] }
  0x1a   :  { %281 = vmatpush.bf16.msra.mxu1 %v724_v59  ;;  %294 = vmatpush.bf16.msra.mxu2 %v728_v60  ;;  %v676_v26 = vor.u32 %v932_v24, %v675_v23  ;;  %v683_v28 = vld [vmem:[%s1402_s3 + $0x8] sm:$0xf]  ;;  %v933_v29 = vld [vmem:[%s1402_s3 + $0x14] sm:$0xf0]  ;;  %v680_v30 = vor.u32 %v930_v25, %v677_v27  ;;  %v931_v32 = vld [vmem:[%s1402_s3 + $0xc] sm:$0xf] }
  0x1b   :  { %307 = vmatpush.bf16.msra.mxu3 %v732_v63  ;;  %320 = vmatpush.bf16.msrb.mxu0 %v736_v2  ;;  %v684_v31 = vor.u32 %v933_v29, %v683_v28  ;;  %v685_v33 = vld [vmem:[%s1402_s3 + $0x18] sm:$0xf0]  ;;  %v968_v39 = vld [vmem:[%s1404_s5 + $0x30] sm:$0xff]  ;;  %v967_v43 = vld [vmem:[%s1404_s5 + $0x28] sm:$0xff]  ;;  %s656_s17 = sshll.u32 %s1051_s16, 4  ;;  %s658_s20 = sshll.u32 %s1406_s7, 4  ;;  %s657_s17 = int_to_ptr.vmem [resolvable:$true] %s656_s17  ;;  %s659_s20 = int_to_ptr.hbm [resolvable:$true] %s658_s20 }
  0x1c   :  { %v688_v34 = vor.u32 %v931_v32, %v685_v33  ;;  %v969_v35 = vld [vmem:[%s1404_s5 + $0x38] sm:$0xff]  ;;  %v992_v40 = vld [vmem:[%s1404_s5 + $0xf0] sm:$0xff]  ;;  %v991_v44 = vld [vmem:[%s1404_s5 + $0xe8] sm:$0xff]  ;;  %vm649_vm1 = vcmask 48128  }
  0x1d   :  { %v993_v36 = vld [vmem:[%s1404_s5 + $0xf8] sm:$0xff]  ;;  %v976_v41 = vld [vmem:[%s1404_s5 + $0x70] sm:$0xff]  ;;  %v975_v45 = vld [vmem:[%s1404_s5 + $0x68] sm:$0xff] }
  0x1e   :  { %282 = vmatpush.bf16.msra.mxu1 %v708_v7  ;;  %295 = vmatpush.bf16.msra.mxu2 %v712_v8  ;;  %v977_v37 = vld [vmem:[%s1404_s5 + $0x78] sm:$0xff]  ;;  %v984_v42 = vld [vmem:[%s1404_s5 + $0xb0] sm:$0xff]  ;;  %v983_v46 = vld [vmem:[%s1404_s5 + $0xa8] sm:$0xff] }
  0x1f   :  { %308 = vmatpush.bf16.msra.mxu3 %v716_v9  ;;  %321 = vmatpush.bf16.msrb.mxu0 %v720_v10  ;;  %v985_v38 = vld [vmem:[%s1404_s5 + $0xb8] sm:$0xff]  ;;  %v966_v47 = vld [vmem:[%s1404_s5 + $0x20] sm:$0xff]  ;;  %v964_v55 = vld [vmem:[%s1404_s5 + $0x10] sm:$0xff] }
  0x20   :  { %v990_v48 = vld [vmem:[%s1404_s5 + $0xe0] sm:$0xff]  ;;  %v965_v51 = vld [vmem:[%s1404_s5 + $0x18] sm:$0xff]  ;;  %v988_v56 = vld [vmem:[%s1404_s5 + $0xd0] sm:$0xff] }
  0x21   :  { %v974_v49 = vld [vmem:[%s1404_s5 + $0x60] sm:$0xff]  ;;  %v989_v52 = vld [vmem:[%s1404_s5 + $0xd8] sm:$0xff]  ;;  %v963_v63 = vld [vmem:[%s1404_s5 + $0x8] sm:$0xff] }
  0x22   :  { %283 = vmatpush.bf16.msra.mxu1 %v692_v14  ;;  %296 = vmatpush.bf16.msra.mxu2 %v696_v18  ;;  %v982_v50 = vld [vmem:[%s1404_s5 + $0xa0] sm:$0xff]  ;;  %v973_v53 = vld [vmem:[%s1404_s5 + $0x58] sm:$0xff]  ;;  %v987_v0 = vld [vmem:[%s1404_s5 + $0xc8] sm:$0xff] }
  0x23   :  { %309 = vmatpush.bf16.msra.mxu3 %v700_v19  ;;  %322 = vmatpush.bf16.msrb.mxu0 %v704_v22  ;;  %v981_v54 = vld [vmem:[%s1404_s5 + $0x98] sm:$0xff]  ;;  %v996_v57 = vld [vmem:[%s1401_s2] ss:$0 sm:$0xff]  ;;  %v972_v1 = vld [vmem:[%s1404_s5 + $0x50] sm:$0xff] }
  0x24   :  { %v980_v2 = vld [vmem:[%s1404_s5 + $0x90] sm:$0xff]  ;;  %v962_v3 = vld [vmem:[%s1404_s5] sm:$0xff]  ;;  %v971_v5 = vld [vmem:[%s1404_s5 + $0x48] sm:$0xff] }
  0x25   :  { %v986_v4 = vld [vmem:[%s1404_s5 + $0xc0] sm:$0xff]  ;;  %v979_v6 = vld [vmem:[%s1404_s5 + $0x88] sm:$0xff] }
  0x26   :  { %284 = vmatpush.bf16.msra.mxu1 %v676_v26  ;;  %297 = vmatpush.bf16.msra.mxu2 %v680_v30  ;;  %v970_v7 = vld [vmem:[%s1404_s5 + $0x40] sm:$0xff] }
  0x27   :  { %310 = vmatpush.bf16.msra.mxu3 %v684_v31  ;;  %323 = vmatpush.bf16.msrb.mxu0 %v688_v34  ;;  %v978_v8 = vld [vmem:[%s1404_s5 + $0x80] sm:$0xff] }
  0x28   :  { %v107_v9 = vld [vmem:[#allocation2] sm:$0xf] }
  0x29   :  { %v109_v10 = vperm.slane %v107_v9, 0  ;;  %v112_v11 = vperm.slane %v107_v9, 3  ;;  %v110_v17 = vperm.slane %v107_v9, 1  ;;  %v111_v19 = vperm.slane %v107_v9, 2 }
  0x2a   :  { %597 = vmatpush.bf16.msrb.mxu1 %v969_v35  ;;  %610 = vmatpush.bf16.msrb.mxu2 %v977_v37 }
  0x2b   :  { %636 = vmatpush.bf16.msra.mxu0 %v993_v36  ;;  %623 = vmatpush.bf16.msrb.mxu3 %v985_v38  ;;  %v997_v36 = vld [vmem:[%s1405_s6] ss:$0 sm:$0xff] }
  0x2e   :  { %598 = vmatpush.bf16.msrb.mxu1 %v968_v39  ;;  %611 = vmatpush.bf16.msrb.mxu2 %v976_v41 }
  0x2f   :  { %637 = vmatpush.bf16.msra.mxu0 %v992_v40  ;;  %624 = vmatpush.bf16.msrb.mxu3 %v984_v42 }
  0x32   :  { %599 = vmatpush.bf16.msrb.mxu1 %v967_v43  ;;  %612 = vmatpush.bf16.msrb.mxu2 %v975_v45 }
  0x33   :  { %638 = vmatpush.bf16.msra.mxu0 %v991_v44  ;;  %625 = vmatpush.bf16.msrb.mxu3 %v983_v46 }
  0x36   :  { %600 = vmatpush.bf16.msrb.mxu1 %v966_v47  ;;  %613 = vmatpush.bf16.msrb.mxu2 %v974_v49 }
  0x37   :  { %639 = vmatpush.bf16.msra.mxu0 %v990_v48  ;;  %626 = vmatpush.bf16.msrb.mxu3 %v982_v50 }
  0x3a   :  { %601 = vmatpush.bf16.msrb.mxu1 %v965_v51  ;;  %614 = vmatpush.bf16.msrb.mxu2 %v973_v53 }
  0x3b   :  { %640 = vmatpush.bf16.msra.mxu0 %v989_v52  ;;  %627 = vmatpush.bf16.msrb.mxu3 %v981_v54 }
  0x3e   :  { %602 = vmatpush.bf16.msrb.mxu1 %v964_v55  ;;  %615 = vmatpush.bf16.msrb.mxu2 %v972_v1 }
  0x3f   :  { %641 = vmatpush.bf16.msra.mxu0 %v988_v56  ;;  %628 = vmatpush.bf16.msrb.mxu3 %v980_v2 }
  0x42   :  { %603 = vmatpush.bf16.msrb.mxu1 %v963_v63  ;;  %616 = vmatpush.bf16.msrb.mxu2 %v971_v5 }
  0x43   :  { %642 = vmatpush.bf16.msra.mxu0 %v987_v0  ;;  %629 = vmatpush.bf16.msrb.mxu3 %v979_v6 }
  0x46   :  { %604 = vmatpush.bf16.msrb.mxu1 %v962_v3  ;;  %617 = vmatpush.bf16.msrb.mxu2 %v970_v7 }
  0x47   :  { %643 = vmatpush.bf16.msra.mxu0 %v986_v4  ;;  %630 = vmatpush.bf16.msrb.mxu3 %v978_v8 }
  0x86   :  { %v69_v58 = vpop.f32.mrf.mxu0 }
  0x87   :  { %v70_v59 = vadd.f32 %v996_v57, %v69_v58 }
  0x89   :  { %v73_v60 = vmax.f32 %v70_v59, 0.0 }
  0x8b   :  { %v74_v61 = vpack.c.bf16 %v73_v60, %v73_v60 }
  0x8d   :  { %285 = vmatmul.bf16.vlgmr.msra.gmra.mxu1 %v74_v61  ;;  %298 = vmatmul.bf16.vlgmr.msra.gmra.mxu2 %v74_v61 }
  0x8e   :  { %311 = vmatmul.bf16.vlgmr.msra.gmra.mxu3 %v74_v61  ;;  %324 = vmatmul.bf16.vlgmr.msrb.gmra.mxu0 %v74_v61  ;;  %v71_v62 = vpop.f32.mrf.mxu0 }
 0x10a   :  { %v286_v12 = vpop.f32.mrf.mxu1 }
 0x10b   :  { %v287_v13 = vadd.f32 %v286_v12, %v109_v10  ;;  %v325_v14 = vpop.f32.mrf.mxu0 }
 0x10c   :  { %v326_v15 = vadd.f32 %v325_v14, %v112_v11 }
 0x10d   :  { %v329_v16 = vmax.f32 %v287_v13, 0.0 }
 0x10e   :  { %v332_v18 = vmax.f32 %v326_v15, 0.0 }
 0x10f   :  { %v333_v20 = vpack.c.bf16 %v329_v16, %v329_v16 }
 0x110   :  { %v336_v21 = vpack.c.bf16 %v332_v18, %v332_v18  ;;  %v299_v22 = vpop.f32.mrf.mxu2 }
 0x111   :  { %v300_v23 = vadd.f32 %v299_v22, %v110_v17  ;;  %v312_v24 = vpop.f32.mrf.mxu3  ;;  %605 = vmatmul.bf16.vlgmr.msrb.gmra.mxu1 %v333_v20 }
 0x112   :  { %v313_v25 = vadd.f32 %v312_v24, %v111_v19  ;;  %644 = vmatmul.bf16.vlgmr.msra.gmra.mxu0 %v336_v21  ;;  %v288_v26 = vpop.f32.mrf.mxu1 }
 0x113   :  { %v330_v27 = vmax.f32 %v300_v23, 0.0  ;;  %v327_v28 = vpop.f32.mrf.mxu0 }
 0x114   :  { %v331_v29 = vmax.f32 %v313_v25, 0.0 }
 0x115   :  { %v334_v30 = vpack.c.bf16 %v330_v27, %v330_v27 }
 0x116   :  { %v335_v31 = vpack.c.bf16 %v331_v29, %v331_v29 }
 0x117   :  { %618 = vmatmul.bf16.vlgmr.msrb.gmra.mxu2 %v334_v30 }
 0x118   :  { %631 = vmatmul.bf16.vlgmr.msrb.gmra.mxu3 %v335_v31  ;;  %v301_v32 = vpop.f32.mrf.mxu2 }
 0x119   :  { %v314_v33 = vpop.f32.mrf.mxu3 }
 0x18e   :  { %v606_v34 = vpop.f32.mrf.mxu1 }
 0x18f   :  { %v645_v35 = vpop.f32.mrf.mxu0  ;;  %v607_v39 = vadd.f32 %v997_v36, %v606_v34 }
 0x196   :  { %v608_v37 = vpop.f32.mrf.mxu1 }
 0x197   :  { %v647_v38 = vpop.f32.mrf.mxu0 }
 0x19a   :  { %v619_v40 = vpop.f32.mrf.mxu2 }
 0x19b   :  { %v620_v41 = vadd.f32 %v619_v40, %v607_v39  ;;  %v632_v42 = vpop.f32.mrf.mxu3 }
 0x19d   :  { %v633_v43 = vadd.f32 %v632_v42, %v620_v41 }
 0x19f   :  { %v646_v44 = vadd.f32 %v645_v35, %v633_v43 }
 0x1a1   :  { %650 = vst.msk [vmem:[#allocation5] sm:$0xff] %vm649_vm1, %v646_v44 }
 0x1a2   :  { %v621_v45 = vpop.f32.mrf.mxu2  ;;  %661 = dma.vmem_to_hbm [thread:$0]  %s657_s17, 128, %s659_s20, [#allocation4]  }
 0x1a3   :  { %v634_v46 = vpop.f32.mrf.mxu3 }
 0x1a4   :  { %1048 = dma.done.wait [#allocation4], 128  }
 0x1a5   :  { %1049 = vsyncadd [#allocation4], 4294967168 }
 0x1a6   :  { %666 = vsyncpa [#allocation3], 1 }
 0x1a7   :  { %667 = vsyncpa [#allocation4], 1 }

</bundles_post_ra>
